<compile_context>
chip_gen: v7x
topology: tpu7x:2x2x1
jax: 0.10.0
libtpu: 0.0.40
codegen_flags: <defaults>
</compile_context>

<pallas_src>
import functools

import jax
import jax.numpy as jnp
from jax.experimental import pallas as pl
from jax.experimental.pallas import tpu as pltpu


def _round_up(n, m):
    return ((n + m - 1) // m) * m


def _lstm_kernel(x_ref, w_ref, out_ref, *,
                 seq_len, batch, b_pad, hidden, i_pad, h_pad):
    """Fused 2-layer LSTM (PyTorch gate order i,f,g,o) + ReLU + Linear."""
    S, B, Bp, H = seq_len, batch, b_pad, hidden
    O = out_ref.shape[1]

    # Static, sublane-aligned row offsets inside the packed weight buffer.
    r_b = i_pad                   # packed bias row (both layers, interleaved)
    r_wr = r_b + 8                # packed recurrent block matrix (2H, 8H)
    r_wl = r_wr + 2 * H           # layer-1-only tail weights (2H, 4H)
    r_bl = r_wl + 2 * H           # layer-1 tail bias (1, 4H)
    r_wo = r_bl + 8               # output Linear weight (H rows, lanes 0:O)
    r_bo = r_wo + h_pad           # output Linear bias (1 row, lanes 0:O)

    w_in = w_ref[0:i_pad, :]                       # (Ipad, 8H)
    b_pk = w_ref[r_b:r_b + 1, :]                   # (1, 8H)
    w_rec = w_ref[r_wr:r_wr + 2 * H, :]            # (2H, 8H)
    w_last = w_ref[r_wl:r_wl + 2 * H, 0:4 * H]     # (2H, 4H)
    b_last = w_ref[r_bl:r_bl + 1, 0:4 * H]         # (1, 4H)
    w_out = w_ref[r_wo:r_wo + H, :]                # (H, 8H), lanes >= O are 0
    b_out = w_ref[r_bo:r_bo + 1, :]                # (1, 8H), lanes >= O are 0

    # ---- Phase 1 (off the serial chain): layer-0 input projections for ALL
    # timesteps, both layers' biases folded in, one MXU matmul.
    gx = jnp.dot(x_ref[...], w_in, preferred_element_type=jnp.float32) + b_pk

    def packed_cell(gates, c_pk):
        # gates: (Bp, 8H) = [i0 i1 | f0 f1 | g0 g1 | o0 o1]; i/f/o inputs are
        # pre-scaled by 0.5 so sigmoid(z) == 0.5*tanh(z/2)+0.5: ONE tanh EUP
        # push over the whole block plus one affine recovers every gate.
        t = jnp.tanh(gates)
        s = 0.5 * t + 0.5
        i_g = s[:, 0:2 * H]
        f_g = s[:, 2 * H:4 * H]
        g_g = t[:, 4 * H:6 * H]
        o_g = s[:, 6 * H:8 * H]
        c_new = f_g * c_pk + i_g * g_g
        h_new = o_g * jnp.tanh(c_new)
        return h_new, c_new

    # Layer-0 step 0 with zero initial state; the layer-1 half of the packed
    # state is forced back to its zero initial value (one-time mask).
    h_pk, c_pk = packed_cell(gx[0:Bp, :], jnp.zeros((Bp, 2 * H), jnp.float32))
    lane = jax.lax.broadcasted_iota(jnp.int32, (1, 2 * H), 1)
    lmask = (lane < H).astype(jnp.float32)
    h_pk = h_pk * lmask
    c_pk = c_pk * lmask

    # ---- Phase 2: skewed fused recurrence. Iteration t computes layer-0
    # step t AND layer-1 step t-1 with ONE (Bp, 2H) @ (2H, 8H) matmul + ONE
    # packed cell; gx[t] already carries Wih0@x_t + b0 and b1.
    # TODO(synk): for much larger S switch to lax.fori_loop(unroll=k) and hold
    # w_rec resident in the MXU via pltpu.matmul_push_rhs/acc_lhs/pop.
    for t in range(1, S):
        gates = (jnp.dot(h_pk, w_rec, preferred_element_type=jnp.float32)
                 + gx[t * Bp:(t + 1) * Bp, :])
        h_pk, c_pk = packed_cell(gates, c_pk)

    # ---- Phase 3: final layer-1 step S-1 only -> half-width matmul against
    # the layer-1 block [Wih1; Whh1] in gate order [i f g o].
    gl = jnp.dot(h_pk, w_last, preferred_element_type=jnp.float32) + b_last
    t1 = jnp.tanh(gl)
    s1 = 0.5 * t1 + 0.5
    c1 = s1[:, H:2 * H] * c_pk[:, H:2 * H] + s1[:, 0:H] * t1[:, 2 * H:3 * H]
    h1 = s1[:, 3 * H:4 * H] * jnp.tanh(c1)

    # relu(output)[:, -1] @ W_out^T + b_out.
    y = (jnp.dot(jnp.maximum(h1, 0.0), w_out,
                 preferred_element_type=jnp.float32) + b_out)
    out_ref[...] = y[0:B, 0:O]


def _pack_weights(params, n_hidden, i_pad, h_pad):
    """Coalesce all weights/biases into one 256-lane, sublane-aligned buffer."""
    H = n_hidden
    f32 = jnp.float32

    # PyTorch layout: W_* is (4H, fan_in), rows [i; f; g; o]. Transpose so the
    # gate blocks live on the columns.
    wih0 = params["wih0"].astype(f32).T          # (I, 4H)
    whh0 = params["whh0"].astype(f32).T          # (H, 4H)
    wih1 = params["wih1"].astype(f32).T          # (H, 4H)
    whh1 = params["whh1"].astype(f32).T          # (H, 4H)
    b0 = (params["bih0"] + params["bhh0"]).astype(f32)[None, :]
    b1 = (params["bih1"] + params["bhh1"]).astype(f32)[None, :]

    # Sigmoid-via-tanh: pre-scale the i/f/o pre-activations by 0.5.
    gs = jnp.concatenate([jnp.full((2 * H,), 0.5, f32),      # i, f
                          jnp.ones((H,), f32),               # g
                          jnp.full((H,), 0.5, f32)])         # o
    scale = lambda a: a * gs[None, :]
    wih0, whh0, wih1, whh1, b0, b1 = map(scale, (wih0, whh0, wih1, whh1, b0, b1))

    def interleave(a0, a1):
        # (rows, 4H) x2, gate-ordered -> (rows, 8H) [i0 i1 f0 f1 g0 g1 o0 o1].
        r = a0.shape[0]
        return jnp.stack([a0.reshape(r, 4, H), a1.reshape(r, 4, H)],
                         axis=2).reshape(r, 8 * H)

    w_in = interleave(wih0, jnp.zeros_like(wih0))                    # (I, 8H)
    b_pk = interleave(b0, b1)                                        # (1, 8H)
    w_rec = jnp.concatenate([interleave(whh0, wih1),
                             interleave(jnp.zeros_like(whh1), whh1)],
                            axis=0)                                  # (2H, 8H)
    w_last = jnp.concatenate([wih1, whh1], axis=0)                   # (2H, 4H)
    b_last = b1                                                      # (1, 4H)
    w_out = params["wout"].astype(f32).T                             # (H, O)
    b_out = params["bout"].astype(f32)[None, :]                      # (1, O)

    def block(a, rows):
        out = jnp.zeros((rows, 8 * H), f32)
        return out.at[:a.shape[0], :a.shape[1]].set(a)

    return jnp.concatenate([
        block(w_in, i_pad), block(b_pk, 8), block(w_rec, 2 * H),
        block(w_last, 2 * H), block(b_last, 8),
        block(w_out, h_pad), block(b_out, 8)], axis=0)


def lstm_forward(x, params):
    """x: (batch, seq, n_input) float32 -> (batch, n_output) float32."""
    B, S, I = x.shape
    H = params["whh0"].shape[1]
    O = params["wout"].shape[0]
    Ipad = max(8, _round_up(I, 8))
    Hpad = _round_up(H, 8)
    Bpad = max(8, _round_up(B, 8))

    # Time-major; batch padded to a full 8-sublane group so every per-timestep
    # slice inside the kernel is (8,128)-aligned. Padded rows/cols are zero.
    x_tm = jnp.zeros((S, Bpad, Ipad), jnp.float32)
    x_tm = x_tm.at[:, :B, :I].set(jnp.transpose(x, (1, 0, 2)))
    x_tm = x_tm.reshape(S * Bpad, Ipad)

    wbuf = _pack_weights(params, H, Ipad, Hpad)

    kernel = functools.partial(_lstm_kernel, seq_len=S, batch=B, b_pad=Bpad,
                               hidden=H, i_pad=Ipad, h_pad=Hpad)
    vmem = pl.BlockSpec(memory_space=pltpu.MemorySpace.VMEM)
    return pl.pallas_call(
        kernel,
        out_shape=jax.ShapeDtypeStruct((B, O), jnp.float32),
        in_specs=[vmem, vmem],
        out_specs=vmem,
    )(x_tm, wbuf)


def _reference(x, params):
    """Pure-JAX reference of the PyTorch forward for verification."""
    B, S, _ = x.shape
    H = params["whh0"].shape[1]

    def layer(seq_in, wih, whh, b):
        h = jnp.zeros((B, H), jnp.float32)
        c = jnp.zeros((B, H), jnp.float32)
        outs = []
        for t in range(S):
            g = seq_in[:, t, :] @ wih.T + h @ whh.T + b
            i = jax.nn.sigmoid(g[:, 0:H])
            f = jax.nn.sigmoid(g[:, H:2 * H])
            gg = jnp.tanh(g[:, 2 * H:3 * H])
            o = jax.nn.sigmoid(g[:, 3 * H:4 * H])
            c = f * c + i * gg
            h = o * jnp.tanh(c)
            outs.append(h)
        return jnp.stack(outs, axis=1)

    o0 = layer(x, params["wih0"], params["whh0"], params["bih0"] + params["bhh0"])
    o1 = layer(o0, params["wih1"], params["whh1"], params["bih1"] + params["bhh1"])
    y = jnp.maximum(o1, 0.0) @ params["wout"].T + params["bout"]
    return y[:, -1]


def make_params(key, n_input, n_hidden, n_output):
    """Deterministic synthetic params (PyTorch uniform(-1/sqrt(H), 1/sqrt(H)))."""
    k = 1.0 / jnp.sqrt(jnp.float32(n_hidden))
    keys = jax.random.split(key, 10)
    u = lambda kk, shape: jax.random.uniform(kk, shape, jnp.float32, -k, k)
    return {
        "wih0": u(keys[0], (4 * n_hidden, n_input)),
        "whh0": u(keys[1], (4 * n_hidden, n_hidden)),
        "bih0": u(keys[2], (4 * n_hidden,)),
        "bhh0": u(keys[3], (4 * n_hidden,)),
        "wih1": u(keys[4], (4 * n_hidden, n_hidden)),
        "whh1": u(keys[5], (4 * n_hidden, n_hidden)),
        "bih1": u(keys[6], (4 * n_hidden,)),
        "bhh1": u(keys[7], (4 * n_hidden,)),
        "wout": u(keys[8], (n_output, n_hidden)),
        "bout": u(keys[9], (n_output,)),
    }


if __name__ == "__main__":
    # small shapes consistent with the module (num_layers=2 hard-wired above)
    batch, seq, n_input, n_hidden, n_output = 4, 8, 8, 32, 4

    root = jax.random.PRNGKey(0)
    kx, kp = jax.random.split(root)
    x = jax.random.normal(kx, (batch, seq, n_input), jnp.float32)
    params = make_params(kp, n_input, n_hidden, n_output)

    y = jax.block_until_ready(lstm_forward(x, params))
    y_ref = jax.block_until_ready(_reference(x, params))

    assert y.shape == (batch, n_output)
    err = float(jnp.max(jnp.abs(y - y_ref)))
    assert jnp.allclose(y, y_ref, atol=2e-4, rtol=2e-4), f"max abs err {err}"
    print("KERNEL_OK")
</pallas_src>

<mosaic_0001>
module attributes {stable_mosaic.version = 11 : i64} {
  func.func @_lstm_kernel(%arg0: memref<64x8xf32, #tpu.memory_space<vmem>>, %arg1: memref<192x256xf32, #tpu.memory_space<vmem>>, %arg2: memref<4x4xf32, #tpu.memory_space<vmem>>) attributes {dimension_semantics = [], scalar_prefetch = 0 : i64, scratch_operands = 0 : i64, tpu.core_type = #tpu.core_type<tc>} {
    %c0 = arith.constant 0 : index
    %c0_0 = arith.constant 0 : index
    %0 = vector.load %arg1[%c0, %c0_0] : memref<192x256xf32, #tpu.memory_space<vmem>>, vector<8x256xf32>
    %c8 = arith.constant 8 : index
    %c0_1 = arith.constant 0 : index
    %1 = vector.load %arg1[%c8, %c0_1] : memref<192x256xf32, #tpu.memory_space<vmem>>, vector<1x256xf32>
    %c16 = arith.constant 16 : index
    %c0_2 = arith.constant 0 : index
    %2 = vector.load %arg1[%c16, %c0_2] : memref<192x256xf32, #tpu.memory_space<vmem>>, vector<64x256xf32>
    %c80 = arith.constant 80 : index
    %c0_3 = arith.constant 0 : index
    %3 = vector.load %arg1[%c80, %c0_3] : memref<192x256xf32, #tpu.memory_space<vmem>>, vector<64x128xf32>
    %c144 = arith.constant 144 : index
    %c0_4 = arith.constant 0 : index
    %4 = vector.load %arg1[%c144, %c0_4] : memref<192x256xf32, #tpu.memory_space<vmem>>, vector<1x128xf32>
    %c152 = arith.constant 152 : index
    %c0_5 = arith.constant 0 : index
    %5 = vector.load %arg1[%c152, %c0_5] : memref<192x256xf32, #tpu.memory_space<vmem>>, vector<32x256xf32>
    %c184 = arith.constant 184 : index
    %c0_6 = arith.constant 0 : index
    %6 = vector.load %arg1[%c184, %c0_6] : memref<192x256xf32, #tpu.memory_space<vmem>>, vector<1x256xf32>
    %c0_7 = arith.constant 0 : index
    %c0_8 = arith.constant 0 : index
    %7 = vector.load %arg0[%c0_7, %c0_8] : memref<64x8xf32, #tpu.memory_space<vmem>>, vector<64x8xf32>
    %cst = arith.constant dense<0.000000e+00> : vector<64x256xf32>
    %8 = tpu.matmul %7, %0, %cst {dimension_numbers = #tpu.dot_dimension_numbers<[1], [0], [0], [1], [0, 0, 1, 1], [], []>} : vector<64x8xf32>, vector<8x256xf32>, vector<64x256xf32> -> vector<64x256xf32>
    %9 = vector.broadcast %1 : vector<1x256xf32> to vector<64x256xf32>
    %10 = arith.addf %8, %9 : vector<64x256xf32>
    %11 = vector.extract_strided_slice %10 {offsets = [0, 0], sizes = [8, 256], strides = [1, 1]} : vector<64x256xf32> to vector<8x256xf32>
    %cst_9 = arith.constant 0.000000e+00 : f32
    %12 = vector.broadcast %cst_9 : f32 to vector<8x64xf32>
    %13 = math.tanh %11 : vector<8x256xf32>
    %cst_10 = arith.constant 5.000000e-01 : f32
    %14 = vector.broadcast %cst_10 : f32 to vector<8x256xf32>
    %15 = arith.mulf %14, %13 : vector<8x256xf32>
    %cst_11 = arith.constant 5.000000e-01 : f32
    %16 = vector.broadcast %cst_11 : f32 to vector<8x256xf32>
    %17 = arith.addf %15, %16 : vector<8x256xf32>
    %18 = vector.extract_strided_slice %17 {offsets = [0, 0], sizes = [8, 64], strides = [1, 1]} : vector<8x256xf32> to vector<8x64xf32>
    %19 = vector.extract_strided_slice %17 {offsets = [0, 64], sizes = [8, 64], strides = [1, 1]} : vector<8x256xf32> to vector<8x64xf32>
    %20 = vector.extract_strided_slice %13 {offsets = [0, 128], sizes = [8, 64], strides = [1, 1]} : vector<8x256xf32> to vector<8x64xf32>
    %21 = vector.extract_strided_slice %17 {offsets = [0, 192], sizes = [8, 64], strides = [1, 1]} : vector<8x256xf32> to vector<8x64xf32>
    %22 = arith.mulf %19, %12 : vector<8x64xf32>
    %23 = arith.mulf %18, %20 : vector<8x64xf32>
    %24 = arith.addf %22, %23 : vector<8x64xf32>
    %25 = math.tanh %24 : vector<8x64xf32>
    %26 = arith.mulf %21, %25 : vector<8x64xf32>
    %27 = tpu.iota {dimensions = array<i32: 1>} : vector<1x64xi32>
    %c32_i32 = arith.constant 32 : i32
    %28 = vector.broadcast %c32_i32 : i32 to vector<1x64xi32>
    %29 = arith.cmpi slt, %27, %28 : vector<1x64xi32>
    %30 = arith.extui %29 : vector<1x64xi1> to vector<1x64xi32>
    %31 = arith.sitofp %30 : vector<1x64xi32> to vector<1x64xf32>
    %32 = vector.broadcast %31 : vector<1x64xf32> to vector<8x64xf32>
    %33 = arith.mulf %26, %32 : vector<8x64xf32>
    %34 = vector.broadcast %31 : vector<1x64xf32> to vector<8x64xf32>
    %35 = arith.mulf %24, %34 : vector<8x64xf32>
    %cst_12 = arith.constant dense<0.000000e+00> : vector<8x256xf32>
    %36 = tpu.matmul %33, %2, %cst_12 {dimension_numbers = #tpu.dot_dimension_numbers<[1], [0], [0], [1], [0, 0, 1, 1], [], []>} : vector<8x64xf32>, vector<64x256xf32>, vector<8x256xf32> -> vector<8x256xf32>
    %37 = vector.extract_strided_slice %10 {offsets = [8, 0], sizes = [8, 256], strides = [1, 1]} : vector<64x256xf32> to vector<8x256xf32>
    %38 = arith.addf %36, %37 : vector<8x256xf32>
    %39 = math.tanh %38 : vector<8x256xf32>
    %cst_13 = arith.constant 5.000000e-01 : f32
    %40 = vector.broadcast %cst_13 : f32 to vector<8x256xf32>
    %41 = arith.mulf %40, %39 : vector<8x256xf32>
    %cst_14 = arith.constant 5.000000e-01 : f32
    %42 = vector.broadcast %cst_14 : f32 to vector<8x256xf32>
    %43 = arith.addf %41, %42 : vector<8x256xf32>
    %44 = vector.extract_strided_slice %43 {offsets = [0, 0], sizes = [8, 64], strides = [1, 1]} : vector<8x256xf32> to vector<8x64xf32>
    %45 = vector.extract_strided_slice %43 {offsets = [0, 64], sizes = [8, 64], strides = [1, 1]} : vector<8x256xf32> to vector<8x64xf32>
    %46 = vector.extract_strided_slice %39 {offsets = [0, 128], sizes = [8, 64], strides = [1, 1]} : vector<8x256xf32> to vector<8x64xf32>
    %47 = vector.extract_strided_slice %43 {offsets = [0, 192], sizes = [8, 64], strides = [1, 1]} : vector<8x256xf32> to vector<8x64xf32>
    %48 = arith.mulf %45, %35 : vector<8x64xf32>
    %49 = arith.mulf %44, %46 : vector<8x64xf32>
    %50 = arith.addf %48, %49 : vector<8x64xf32>
    %51 = math.tanh %50 : vector<8x64xf32>
    %52 = arith.mulf %47, %51 : vector<8x64xf32>
    %cst_15 = arith.constant dense<0.000000e+00> : vector<8x256xf32>
    %53 = tpu.matmul %52, %2, %cst_15 {dimension_numbers = #tpu.dot_dimension_numbers<[1], [0], [0], [1], [0, 0, 1, 1], [], []>} : vector<8x64xf32>, vector<64x256xf32>, vector<8x256xf32> -> vector<8x256xf32>
    %54 = vector.extract_strided_slice %10 {offsets = [16, 0], sizes = [8, 256], strides = [1, 1]} : vector<64x256xf32> to vector<8x256xf32>
    %55 = arith.addf %53, %54 : vector<8x256xf32>
    %56 = math.tanh %55 : vector<8x256xf32>
    %cst_16 = arith.constant 5.000000e-01 : f32
    %57 = vector.broadcast %cst_16 : f32 to vector<8x256xf32>
    %58 = arith.mulf %57, %56 : vector<8x256xf32>
    %cst_17 = arith.constant 5.000000e-01 : f32
    %59 = vector.broadcast %cst_17 : f32 to vector<8x256xf32>
    %60 = arith.addf %58, %59 : vector<8x256xf32>
    %61 = vector.extract_strided_slice %60 {offsets = [0, 0], sizes = [8, 64], strides = [1, 1]} : vector<8x256xf32> to vector<8x64xf32>
    %62 = vector.extract_strided_slice %60 {offsets = [0, 64], sizes = [8, 64], strides = [1, 1]} : vector<8x256xf32> to vector<8x64xf32>
    %63 = vector.extract_strided_slice %56 {offsets = [0, 128], sizes = [8, 64], strides = [1, 1]} : vector<8x256xf32> to vector<8x64xf32>
    %64 = vector.extract_strided_slice %60 {offsets = [0, 192], sizes = [8, 64], strides = [1, 1]} : vector<8x256xf32> to vector<8x64xf32>
    %65 = arith.mulf %62, %50 : vector<8x64xf32>
    %66 = arith.mulf %61, %63 : vector<8x64xf32>
    %67 = arith.addf %65, %66 : vector<8x64xf32>
    %68 = math.tanh %67 : vector<8x64xf32>
    %69 = arith.mulf %64, %68 : vector<8x64xf32>
    %cst_18 = arith.constant dense<0.000000e+00> : vector<8x256xf32>
    %70 = tpu.matmul %69, %2, %cst_18 {dimension_numbers = #tpu.dot_dimension_numbers<[1], [0], [0], [1], [0, 0, 1, 1], [], []>} : vector<8x64xf32>, vector<64x256xf32>, vector<8x256xf32> -> vector<8x256xf32>
    %71 = vector.extract_strided_slice %10 {offsets = [24, 0], sizes = [8, 256], strides = [1, 1]} : vector<64x256xf32> to vector<8x256xf32>
    %72 = arith.addf %70, %71 : vector<8x256xf32>
    %73 = math.tanh %72 : vector<8x256xf32>
    %cst_19 = arith.constant 5.000000e-01 : f32
    %74 = vector.broadcast %cst_19 : f32 to vector<8x256xf32>
    %75 = arith.mulf %74, %73 : vector<8x256xf32>
    %cst_20 = arith.constant 5.000000e-01 : f32
    %76 = vector.broadcast %cst_20 : f32 to vector<8x256xf32>
    %77 = arith.addf %75, %76 : vector<8x256xf32>
    %78 = vector.extract_strided_slice %77 {offsets = [0, 0], sizes = [8, 64], strides = [1, 1]} : vector<8x256xf32> to vector<8x64xf32>
    %79 = vector.extract_strided_slice %77 {offsets = [0, 64], sizes = [8, 64], strides = [1, 1]} : vector<8x256xf32> to vector<8x64xf32>
    %80 = vector.extract_strided_slice %73 {offsets = [0, 128], sizes = [8, 64], strides = [1, 1]} : vector<8x256xf32> to vector<8x64xf32>
    %81 = vector.extract_strided_slice %77 {offsets = [0, 192], sizes = [8, 64], strides = [1, 1]} : vector<8x256xf32> to vector<8x64xf32>
    %82 = arith.mulf %79, %67 : vector<8x64xf32>
    %83 = arith.mulf %78, %80 : vector<8x64xf32>
    %84 = arith.addf %82, %83 : vector<8x64xf32>
    %85 = math.tanh %84 : vector<8x64xf32>
    %86 = arith.mulf %81, %85 : vector<8x64xf32>
    %cst_21 = arith.constant dense<0.000000e+00> : vector<8x256xf32>
    %87 = tpu.matmul %86, %2, %cst_21 {dimension_numbers = #tpu.dot_dimension_numbers<[1], [0], [0], [1], [0, 0, 1, 1], [], []>} : vector<8x64xf32>, vector<64x256xf32>, vector<8x256xf32> -> vector<8x256xf32>
    %88 = vector.extract_strided_slice %10 {offsets = [32, 0], sizes = [8, 256], strides = [1, 1]} : vector<64x256xf32> to vector<8x256xf32>
    %89 = arith.addf %87, %88 : vector<8x256xf32>
    %90 = math.tanh %89 : vector<8x256xf32>
    %cst_22 = arith.constant 5.000000e-01 : f32
    %91 = vector.broadcast %cst_22 : f32 to vector<8x256xf32>
    %92 = arith.mulf %91, %90 : vector<8x256xf32>
    %cst_23 = arith.constant 5.000000e-01 : f32
    %93 = vector.broadcast %cst_23 : f32 to vector<8x256xf32>
    %94 = arith.addf %92, %93 : vector<8x256xf32>
    %95 = vector.extract_strided_slice %94 {offsets = [0, 0], sizes = [8, 64], strides = [1, 1]} : vector<8x256xf32> to vector<8x64xf32>
    %96 = vector.extract_strided_slice %94 {offsets = [0, 64], sizes = [8, 64], strides = [1, 1]} : vector<8x256xf32> to vector<8x64xf32>
    %97 = vector.extract_strided_slice %90 {offsets = [0, 128], sizes = [8, 64], strides = [1, 1]} : vector<8x256xf32> to vector<8x64xf32>
    %98 = vector.extract_strided_slice %94 {offsets = [0, 192], sizes = [8, 64], strides = [1, 1]} : vector<8x256xf32> to vector<8x64xf32>
    %99 = arith.mulf %96, %84 : vector<8x64xf32>
    %100 = arith.mulf %95, %97 : vector<8x64xf32>
    %101 = arith.addf %99, %100 : vector<8x64xf32>
    %102 = math.tanh %101 : vector<8x64xf32>
    %103 = arith.mulf %98, %102 : vector<8x64xf32>
    %cst_24 = arith.constant dense<0.000000e+00> : vector<8x256xf32>
    %104 = tpu.matmul %103, %2, %cst_24 {dimension_numbers = #tpu.dot_dimension_numbers<[1], [0], [0], [1], [0, 0, 1, 1], [], []>} : vector<8x64xf32>, vector<64x256xf32>, vector<8x256xf32> -> vector<8x256xf32>
    %105 = vector.extract_strided_slice %10 {offsets = [40, 0], sizes = [8, 256], strides = [1, 1]} : vector<64x256xf32> to vector<8x256xf32>
    %106 = arith.addf %104, %105 : vector<8x256xf32>
    %107 = math.tanh %106 : vector<8x256xf32>
    %cst_25 = arith.constant 5.000000e-01 : f32
    %108 = vector.broadcast %cst_25 : f32 to vector<8x256xf32>
    %109 = arith.mulf %108, %107 : vector<8x256xf32>
    %cst_26 = arith.constant 5.000000e-01 : f32
    %110 = vector.broadcast %cst_26 : f32 to vector<8x256xf32>
    %111 = arith.addf %109, %110 : vector<8x256xf32>
    %112 = vector.extract_strided_slice %111 {offsets = [0, 0], sizes = [8, 64], strides = [1, 1]} : vector<8x256xf32> to vector<8x64xf32>
    %113 = vector.extract_strided_slice %111 {offsets = [0, 64], sizes = [8, 64], strides = [1, 1]} : vector<8x256xf32> to vector<8x64xf32>
    %114 = vector.extract_strided_slice %107 {offsets = [0, 128], sizes = [8, 64], strides = [1, 1]} : vector<8x256xf32> to vector<8x64xf32>
    %115 = vector.extract_strided_slice %111 {offsets = [0, 192], sizes = [8, 64], strides = [1, 1]} : vector<8x256xf32> to vector<8x64xf32>
    %116 = arith.mulf %113, %101 : vector<8x64xf32>
    %117 = arith.mulf %112, %114 : vector<8x64xf32>
    %118 = arith.addf %116, %117 : vector<8x64xf32>
    %119 = math.tanh %118 : vector<8x64xf32>
    %120 = arith.mulf %115, %119 : vector<8x64xf32>
    %cst_27 = arith.constant dense<0.000000e+00> : vector<8x256xf32>
    %121 = tpu.matmul %120, %2, %cst_27 {dimension_numbers = #tpu.dot_dimension_numbers<[1], [0], [0], [1], [0, 0, 1, 1], [], []>} : vector<8x64xf32>, vector<64x256xf32>, vector<8x256xf32> -> vector<8x256xf32>
    %122 = vector.extract_strided_slice %10 {offsets = [48, 0], sizes = [8, 256], strides = [1, 1]} : vector<64x256xf32> to vector<8x256xf32>
    %123 = arith.addf %121, %122 : vector<8x256xf32>
    %124 = math.tanh %123 : vector<8x256xf32>
    %cst_28 = arith.constant 5.000000e-01 : f32
    %125 = vector.broadcast %cst_28 : f32 to vector<8x256xf32>
    %126 = arith.mulf %125, %124 : vector<8x256xf32>
    %cst_29 = arith.constant 5.000000e-01 : f32
    %127 = vector.broadcast %cst_29 : f32 to vector<8x256xf32>
    %128 = arith.addf %126, %127 : vector<8x256xf32>
    %129 = vector.extract_strided_slice %128 {offsets = [0, 0], sizes = [8, 64], strides = [1, 1]} : vector<8x256xf32> to vector<8x64xf32>
    %130 = vector.extract_strided_slice %128 {offsets = [0, 64], sizes = [8, 64], strides = [1, 1]} : vector<8x256xf32> to vector<8x64xf32>
    %131 = vector.extract_strided_slice %124 {offsets = [0, 128], sizes = [8, 64], strides = [1, 1]} : vector<8x256xf32> to vector<8x64xf32>
    %132 = vector.extract_strided_slice %128 {offsets = [0, 192], sizes = [8, 64], strides = [1, 1]} : vector<8x256xf32> to vector<8x64xf32>
    %133 = arith.mulf %130, %118 : vector<8x64xf32>
    %134 = arith.mulf %129, %131 : vector<8x64xf32>
    %135 = arith.addf %133, %134 : vector<8x64xf32>
    %136 = math.tanh %135 : vector<8x64xf32>
    %137 = arith.mulf %132, %136 : vector<8x64xf32>
    %cst_30 = arith.constant dense<0.000000e+00> : vector<8x256xf32>
    %138 = tpu.matmul %137, %2, %cst_30 {dimension_numbers = #tpu.dot_dimension_numbers<[1], [0], [0], [1], [0, 0, 1, 1], [], []>} : vector<8x64xf32>, vector<64x256xf32>, vector<8x256xf32> -> vector<8x256xf32>
    %139 = vector.extract_strided_slice %10 {offsets = [56, 0], sizes = [8, 256], strides = [1, 1]} : vector<64x256xf32> to vector<8x256xf32>
    %140 = arith.addf %138, %139 : vector<8x256xf32>
    %141 = math.tanh %140 : vector<8x256xf32>
    %cst_31 = arith.constant 5.000000e-01 : f32
    %142 = vector.broadcast %cst_31 : f32 to vector<8x256xf32>
    %143 = arith.mulf %142, %141 : vector<8x256xf32>
    %cst_32 = arith.constant 5.000000e-01 : f32
    %144 = vector.broadcast %cst_32 : f32 to vector<8x256xf32>
    %145 = arith.addf %143, %144 : vector<8x256xf32>
    %146 = vector.extract_strided_slice %145 {offsets = [0, 0], sizes = [8, 64], strides = [1, 1]} : vector<8x256xf32> to vector<8x64xf32>
    %147 = vector.extract_strided_slice %145 {offsets = [0, 64], sizes = [8, 64], strides = [1, 1]} : vector<8x256xf32> to vector<8x64xf32>
    %148 = vector.extract_strided_slice %141 {offsets = [0, 128], sizes = [8, 64], strides = [1, 1]} : vector<8x256xf32> to vector<8x64xf32>
    %149 = vector.extract_strided_slice %145 {offsets = [0, 192], sizes = [8, 64], strides = [1, 1]} : vector<8x256xf32> to vector<8x64xf32>
    %150 = arith.mulf %147, %135 : vector<8x64xf32>
    %151 = arith.mulf %146, %148 : vector<8x64xf32>
    %152 = arith.addf %150, %151 : vector<8x64xf32>
    %153 = math.tanh %152 : vector<8x64xf32>
    %154 = arith.mulf %149, %153 : vector<8x64xf32>
    %cst_33 = arith.constant dense<0.000000e+00> : vector<8x128xf32>
    %155 = tpu.matmul %154, %3, %cst_33 {dimension_numbers = #tpu.dot_dimension_numbers<[1], [0], [0], [1], [0, 0, 1, 1], [], []>} : vector<8x64xf32>, vector<64x128xf32>, vector<8x128xf32> -> vector<8x128xf32>
    %156 = vector.broadcast %4 : vector<1x128xf32> to vector<8x128xf32>
    %157 = arith.addf %155, %156 : vector<8x128xf32>
    %158 = math.tanh %157 : vector<8x128xf32>
    %cst_34 = arith.constant 5.000000e-01 : f32
    %159 = vector.broadcast %cst_34 : f32 to vector<8x128xf32>
    %160 = arith.mulf %159, %158 : vector<8x128xf32>
    %cst_35 = arith.constant 5.000000e-01 : f32
    %161 = vector.broadcast %cst_35 : f32 to vector<8x128xf32>
    %162 = arith.addf %160, %161 : vector<8x128xf32>
    %163 = vector.extract_strided_slice %162 {offsets = [0, 32], sizes = [8, 32], strides = [1, 1]} : vector<8x128xf32> to vector<8x32xf32>
    %164 = vector.extract_strided_slice %152 {offsets = [0, 32], sizes = [8, 32], strides = [1, 1]} : vector<8x64xf32> to vector<8x32xf32>
    %165 = arith.mulf %163, %164 : vector<8x32xf32>
    %166 = vector.extract_strided_slice %162 {offsets = [0, 0], sizes = [8, 32], strides = [1, 1]} : vector<8x128xf32> to vector<8x32xf32>
    %167 = vector.extract_strided_slice %158 {offsets = [0, 64], sizes = [8, 32], strides = [1, 1]} : vector<8x128xf32> to vector<8x32xf32>
    %168 = arith.mulf %166, %167 : vector<8x32xf32>
    %169 = arith.addf %165, %168 : vector<8x32xf32>
    %170 = vector.extract_strided_slice %162 {offsets = [0, 96], sizes = [8, 32], strides = [1, 1]} : vector<8x128xf32> to vector<8x32xf32>
    %171 = math.tanh %169 : vector<8x32xf32>
    %172 = arith.mulf %170, %171 : vector<8x32xf32>
    %cst_36 = arith.constant 0.000000e+00 : f32
    %173 = vector.broadcast %cst_36 : f32 to vector<8x32xf32>
    %174 = arith.maximumf %172, %173 : vector<8x32xf32>
    %cst_37 = arith.constant dense<0.000000e+00> : vector<8x256xf32>
    %175 = tpu.matmul %174, %5, %cst_37 {dimension_numbers = #tpu.dot_dimension_numbers<[1], [0], [0], [1], [0, 0, 1, 1], [], []>} : vector<8x32xf32>, vector<32x256xf32>, vector<8x256xf32> -> vector<8x256xf32>
    %176 = vector.broadcast %6 : vector<1x256xf32> to vector<8x256xf32>
    %177 = arith.addf %175, %176 : vector<8x256xf32>
    %178 = vector.extract_strided_slice %177 {offsets = [0, 0], sizes = [4, 4], strides = [1, 1]} : vector<8x256xf32> to vector<4x4xf32>
    %c0_38 = arith.constant 0 : index
    %c0_39 = arith.constant 0 : index
    %179 = vector.load %arg2[%c0_38, %c0_39] : memref<4x4xf32, #tpu.memory_space<vmem>>, vector<4x4xf32>
    tpu.vector_store %arg2[%c0_38, %c0_39], %178 {strides = array<i32>} : memref<4x4xf32, #tpu.memory_space<vmem>>, vector<4x4xf32>,
    return
  }
}

</mosaic_0001>

<bundles_post_ra>
// kernel: tpu_custom_call.1
= control target key start
LH: loop header
LB: loop body
LE: loop exit
PB: predicated region body
PF: predicated region fallthrough
CT: control target
= control target key end

     0   :  { %7 = vsyncpa [#allocation3], 0  ;;  %s1664_s0 = inlined_call_operand.vmem [shape: f32[64,8], index: 0, kind: input, shape index: {}]   ;;  %s1665_s1 = inlined_call_operand.hbm [shape: f32[192,256], index: 1, kind: input, shape index: {}]   ;;  %s1666_s2 = inlined_call_operand.hbm [shape: f32[4,4], index: 2, kind: output, shape index: {}]  }
   0x1   :  { %8 = vsyncpa [#allocation4], 0  ;;  %s1400_s9 = smov [#allocation2]   ;;  %s1352_s13 = scalar_lea.hbm %s1665_s1, 6144 }
   0x2   :  { %s16_s10 = sshll.u32 %s1400_s9, 4  ;;  %p1353_p0 = scmp.ne.s32.totalorder %s1665_s1, %s1352_s13  ;;  %s17_s10 = int_to_ptr.vmem [resolvable:$true] %s16_s10 }
   0x3   :  { %p1356_p1 = scmp.lt.u32.totalorder %s1352_s13, %s1665_s1 }
   0x5   :  { %p1358_p2 = pnand %p1356_p1, %p1353_p0 }
   0x7   :  { %1361 = shalt.err (!%p1358_p2)
}
   0x8   :  { %s1362_s18 = scalar_lea.vmem %s17_s10, 6144  ;;  %p1367_p4 = scmp.lt.s32.totalorder %s17_s10, %s17_s10 }
   0x9   :  { %p1363_p3 = scmp.ne.s32.totalorder %s17_s10, %s1362_s18  ;;  %p1368_p5 = scmp.lt.s32.totalorder %s1362_s18, %s1362_s18 }
   0xb   :  { %p1369_p6 = por %p1368_p5, %p1367_p4 }
   0xd   :  { %p1370_p7 = pnand %p1369_p6, %p1363_p3 }
   0xf   :  { %1373 = shalt.err (!%p1370_p7)
}
  0x10   :  { %s1401_s19 = smov 256   ;;  %s1402_s20 = smov 16  }
  0x11   :  { %22 = dma.hbm_to_vmem [thread:$0]  %s1665_s1, 6144, %s17_s10, [#allocation3], %s1401_s19, %s1401_s19, %s1402_s20  }
  0x12   :  { %1396 = dma.done.wait [#allocation3], 6144  }
  0x13   :  { %1397 = vsyncadd [#allocation3], 4294961152  ;;  %v1403_v0 = vmov 0.0   ;;  %v27_v1 = vld [vmem:[#allocation2 + $0x8] sm:$0xff]  ;;  %v26_v2 = vld [vmem:[#allocation2] sm:$0xff]  ;;  %vm84_vm0 = vcmask 64512   ;;  %v74_v4 = vlaneseq }
  0x14   :  { %173 = vmatprep.mubr.f32.mxu1 %v1403_v0  ;;  %500 = vmatprep.mubr.f32.mxu0 %v1403_v0  ;;  %v65_v3 = vld [vmem:[%s1664_s0] sm:$0xff]  ;;  %v29_v7 = vld [vmem:[#allocation2 + $0x10] ss:$8 sm:$0x3]  ;;  %s1404_s1 = smov 64   ;;  %v31_v22 = vld [vmem:[#allocation2 + $0x28] sm:$0xff] }
  0x15   :  { %109 = vmatprep.subr.mxu1 %v27_v1  ;;  %v1443_v5 = vshrl.u32 %v74_v4, 7  ;;  %v238_v17 = vand.u32 127, %v74_v4  ;;  %v33_v23 = vld [vmem:[#allocation2 + $0x38] sm:$0xff]  ;;  %v30_v24 = vld [vmem:[#allocation2 + $0x20] sm:$0xff]  ;;  %v32_v26 = vld [vmem:[#allocation2 + $0x30] sm:$0xff]  ;;  %vm251_vm2 = vcmask 523264  }
  0x16   :  { %110 = vmatpush1.msra.mxu1 %v26_v2  ;;  %v1464_v25 = vpack.c.bf16 %v33_v23, %v31_v22  ;;  %v66_v27 = vld [vmem:[%s1664_s0 + $0x8] sm:$0xff]  ;;  %v1469_v28 = vpack.c.bf16 %v32_v26, %v30_v24  ;;  %v37_v30 = vld [vmem:[#allocation2 + $0x58] sm:$0xff]  ;;  %v34_v31 = vld [vmem:[#allocation2 + $0x40] sm:$0xff]  ;;  %vm1406_vm3 = vmmov 0   ;;  %vm995_vm4 = vcmask 261120   ;;  %s1408_s11 = smov [#allocation5]  }
  0x17   :  { %1085 = vmatmul.mubr.msk.f32.vlgmr.msra.gmra.mrb[0].mxu1 %vm84_vm0, %v65_v3  ;;  %v76_v6 = vsub.s32 0, %v1443_v5  ;;  %v80_v8 = vsub.s32 1, %v1443_v5  ;;  %vm239_vm1 = vcmp.lt.s32.totalorder %v238_v17, 32  ;;  %v35_v29 = vld [vmem:[#allocation2 + $0x48] sm:$0xff]  ;;  %v67_v32 = vld [vmem:[%s1664_s0 + $0x10] sm:$0xff]  ;;  %v41_v37 = vld [vmem:[#allocation2 + $0x78] sm:$0xff] }
  0x18   :  { %179 = vmatprep.mubr.f32.mxu1 %v1403_v0  ;;  %v1093_v21 = vsel %vm239_vm1, 1.0, %v1403_v0  ;;  %1132 = vmatprep.subr.bf16.mxu1 %v1464_v25  ;;  %v1477_v33 = vpack.c.bf16 %v37_v30, %v35_v29  ;;  %v36_v34 = vld [vmem:[#allocation2 + $0x50] sm:$0xff]  ;;  %v39_v36 = vld [vmem:[#allocation2 + $0x68] sm:$0xff]  ;;  %v38_v39 = vld [vmem:[#allocation2 + $0x60] sm:$0xff]  ;;  %s1076_s12 = sshll.u32 %s1408_s11, 4  ;;  %vm1068_vm5 = vcmask 27648   ;;  %s1077_s12 = int_to_ptr.vmem [resolvable:$true] %s1076_s12 }
  0x19   :  { %v1449_v9 = vrot.slane %v29_v7, %v76_v6  ;;  %v1451_v10 = vrot.slane %v29_v7, %v80_v8  ;;  %1134 = vmatpush1.bf16.msra.mxu1 %v1469_v28  ;;  %v1480_v35 = vpack.c.bf16 %v36_v34, %v34_v31  ;;  %1164 = vmatprep.subr.bf16.mxu0 %v1464_v25  ;;  %v40_v40 = vld [vmem:[#allocation2 + $0x70] sm:$0xff]  ;;  %v43_v41 = vld [vmem:[#allocation2 + $0x88] sm:$0xff]  ;;  %v45_v42 = vld [vmem:[#allocation2 + $0x98] sm:$0xff]  ;;  %s1374_s13 = scalar_lea.vmem %s1077_s12, 64  ;;  %p1379_p9 = scmp.lt.s32.totalorder %s1077_s12, %s1077_s12 }
  0x1a   :  { %1136 = vmatprep.subr.bf16.mxu1 %v1477_v33  ;;  %v1484_v38 = vpack.c.bf16 %v41_v37, %v39_v36  ;;  %1166 = vmatpush1.bf16.msra.mxu0 %v1469_v28  ;;  %v68_v43 = vld [vmem:[%s1664_s0 + $0x18] sm:$0xff]  ;;  %v1494_v44 = vpack.c.bf16 %v40_v40, %v38_v39  ;;  %v1497_v45 = vpack.c.bf16 %v45_v42, %v43_v41  ;;  %v42_v46 = vld [vmem:[#allocation2 + $0x80] sm:$0xff]  ;;  %v44_v47 = vld [vmem:[#allocation2 + $0x90] sm:$0xff]  ;;  %p1375_p8 = scmp.ne.s32.totalorder %s1077_s12, %s1374_s13  ;;  %p1380_p10 = scmp.lt.s32.totalorder %s1374_s13, %s1374_s13 }
  0x1b   :  { %1086 = vmatmul.mubr.msk.f32.gmra.mrb[2].mxu1 %vm84_vm0, %v66_v27  ;;  %1168 = vmatprep.subr.bf16.mxu0 %v1477_v33  ;;  %v69_v48 = vld [vmem:[%s1664_s0 + $0x20] sm:$0xff]  ;;  %v1507_v49 = vpack.c.bf16 %v44_v47, %v42_v46  ;;  %v70_v50 = vld [vmem:[%s1664_s0 + $0x28] sm:$0xff]  ;;  %v71_v51 = vld [vmem:[%s1664_s0 + $0x30] sm:$0xff] }
  0x1c   :  { %185 = vmatprep.mubr.f32.mxu1 %v1403_v0  ;;  %v72_v52 = vld [vmem:[%s1664_s0 + $0x38] sm:$0xff]  ;;  %s1407_s0 = smov 32   ;;  %p1381_p11 = por %p1380_p10, %p1379_p9 }
  0x1d   :  { %1138 = vmatpush1.bf16.msra.mxu1 %v1480_v35 }
  0x1e   :  { %1140 = vmatprep.subr.bf16.mxu1 %v1484_v38  ;;  %1170 = vmatpush1.bf16.msra.mxu0 %v1480_v35  ;;  %p1382_p12 = pnand %p1381_p11, %p1375_p8 }
  0x1f   :  { %1087 = vmatmul.mubr.msk.f32.gmra.mrb[4].mxu1 %vm84_vm0, %v67_v32  ;;  %1172 = vmatprep.subr.bf16.mxu0 %v1484_v38 }
  0x20   :  { %191 = vmatprep.mubr.f32.mxu1 %v1403_v0 }
  0x21   :  { %1142 = vmatpush1.bf16.msra.mxu1 %v1494_v44 }
  0x22   :  { %1144 = vmatprep.subr.bf16.mxu1 %v1497_v45  ;;  %1174 = vmatpush1.bf16.msra.mxu0 %v1494_v44 }
  0x23   :  { %1088 = vmatmul.mubr.msk.f32.gmra.mrb[6].mxu1 %vm84_vm0, %v68_v43  ;;  %1176 = vmatprep.subr.bf16.mxu0 %v1497_v45 }
  0x24   :  { %197 = vmatprep.mubr.f32.mxu1 %v1403_v0 }
  0x25   :  { %1146 = vmatpush1.bf16.msra.mxu1 %v1507_v49 }
  0x26   :  { %1148 = vmatprep.subr.bf16.mxu1 %v1464_v25  ;;  %1178 = vmatpush1.bf16.msra.mxu0 %v1507_v49 }
  0x27   :  { %1089 = vmatmul.mubr.msk.f32.gmra.mrb[8].mxu1 %vm84_vm0, %v69_v48  ;;  %1180 = vmatprep.subr.bf16.mxu0 %v1464_v25 }
  0x28   :  { %203 = vmatprep.mubr.f32.mxu1 %v1403_v0 }
  0x2b   :  { %1090 = vmatmul.mubr.msk.f32.gmra.mrb[10].mxu1 %vm84_vm0, %v70_v50 }
  0x2c   :  { %209 = vmatprep.mubr.f32.mxu1 %v1403_v0 }
  0x2f   :  { %1091 = vmatmul.mubr.msk.f32.gmra.mrb[12].mxu1 %vm84_vm0, %v71_v51 }
  0x30   :  { %215 = vmatprep.mubr.f32.mxu1 %v1403_v0 }
  0x33   :  { %1092 = vmatmul.mubr.msk.f32.gmra.mrb[14].mxu1 %vm84_vm0, %v72_v52 }
  0x34   :  { %318 = vmatprep.mubr.f32.mxu1 %v1403_v0 }
  0xea   :  { %v175_v11 = vpop.f32.mrb[0].mxu1 }
  0xeb   :  { %v176_v12 = vadd.f32 %v175_v11, %v1449_v9  ;;  %v177_v13 = vpop.f32.mrb[1].mxu1 }
  0xec   :  { %v178_v14 = vadd.f32 %v177_v13, %v1451_v10 }
  0xed   :  { %1300 = vtanh.f32 %v176_v12 }
  0xee   :  { %1302 = vtanh.f32 %v178_v14 }
  0xf6   :  { %v1536_v62 = vpop.f32.mrb[6].mxu1 }
  0xf7   :  { %v1301_v15 = vpop.eup %1300  ;;  %v1538_v63 = vpop.f32.mrb[7].mxu1 }
  0xf8   :  { %v224_v16 = vmul.f32 0.5, %v1301_v15  ;;  %v1457_v19 = vpop.eup %1302 }
  0xf9   :  { %v225_v56 = vmul.f32 0.5, %v1457_v19 }
  0xfa   :  { %v1455_v18 = vadd.f32 0.5, %v224_v16  ;;  %v1540_v1 = vpop.f32.mrb[8].mxu1 }
  0xfb   :  { %v227_v57 = vadd.f32 0.5, %v225_v56  ;;  %v1542_v2 = vpop.f32.mrb[9].mxu1 }
  0xfc   :  { %v229_v20 = vmul.f32 %v1457_v19, %v1455_v18  ;;  %v228_v53 = vmul.f32 0.0, %v1455_v18 }
  0xfe   :  { %231 = vrot.lane.b32.xlu0 %v229_v20, %s1404_s1  ;;  %v1544_v3 = vpop.f32.mrb[10].mxu1 }
  0xff   :  { %v1546_v4 = vpop.f32.mrb[11].mxu1 }
 0x102   :  { %243 = vrot.lane.b32.xlu0 %v1093_v21, %s1404_s1  ;;  %v1548_v7 = vpop.f32.mrb[12].mxu1 }
 0x103   :  { %v1550_v8 = vpop.f32.mrb[13].mxu1 }
 0x106   :  { %v1552_v11 = vpop.f32.mrb[14].mxu1 }
 0x107   :  { %v1554_v12 = vpop.f32.mrb[15].mxu1 }
 0x170   :  { %v232_v54 = vpop.permute.xlu0 %231 }
 0x171   :  { %v234_v55 = vadd.f32 %v232_v54, %v228_v53 }
 0x173   :  { %1304 = vtanh.f32 %v234_v55 }
 0x174   :  { %v244_v60 = vpop.permute.xlu0 %243 }
 0x175   :  { %v247_v20 = vmul.f32 %v244_v60, %v234_v55 }
 0x17d   :  { %v1305_v58 = vpop.eup %1304 }
 0x17e   :  { %v236_v59 = vmul.f32 %v1305_v58, %v227_v57  ;;  %v194_v57 = vadd.f32 %v1536_v62, %v1449_v9  ;;  %v196_v58 = vadd.f32 %v1538_v63, %v1451_v10 }
 0x180   :  { %v246_v61 = vmul.f32 %v244_v60, %v236_v59 }
 0x182   :  { %249 = vrot.lane.b32.xlu1 %v246_v61, %s1404_s1 }
 0x1f4   :  { %v250_v13 = vpop.permute.xlu1 %249 }
 0x1f5   :  { %1094 = vmatmul.mubr.msk.f32.vlgmr.msra.gmra.mrb[2].mxu1 %vm251_vm2, %v250_v13 }
 0x1f6   :  { %1150 = vmatpush1.bf16.msra.mxu1 %v1469_v28  ;;  %409 = vmatprep.mubr.f32.mxu1 %v1403_v0 }
 0x1f7   :  { %1152 = vmatprep.subr.bf16.mxu1 %v1477_v33 }
 0x1fa   :  { %1154 = vmatpush1.bf16.msra.mxu1 %v1480_v35 }
 0x1fb   :  { %1156 = vmatprep.subr.bf16.mxu1 %v1484_v38 }
 0x1fe   :  { %1158 = vmatpush1.bf16.msra.mxu1 %v1494_v44 }
 0x1ff   :  { %1160 = vmatprep.subr.bf16.mxu1 %v1497_v45 }
 0x202   :  { %1162 = vmatpush1.bf16.msra.mxu1 %v1507_v49 }
 0x2c8   :  { %v320_v14 = vpop.f32.mrb[2].mxu1 }
 0x2c9   :  { %v1263_v15 = vadd.f32 %v320_v14, %v1449_v9  ;;  %v322_v16 = vpop.f32.mrb[3].mxu1 }
 0x2ca   :  { %v1264_v17 = vadd.f32 %v322_v16, %v1451_v10 }
 0x2cb   :  { %1306 = vtanh.f32 %v1263_v15 }
 0x2cc   :  { %1308 = vtanh.f32 %v1264_v17 }
 0x2d5   :  { %v1307_v18 = vpop.eup %1306 }
 0x2d6   :  { %v327_v19 = vmul.f32 0.5, %v1307_v18  ;;  %v1309_v22 = vpop.eup %1308 }
 0x2d7   :  { %v328_v29 = vmul.f32 0.5, %v1309_v22 }
 0x2d8   :  { %v329_v21 = vadd.f32 0.5, %v327_v19 }
 0x2d9   :  { %v330_v30 = vadd.f32 0.5, %v328_v29 }
 0x2da   :  { %v332_v23 = vmul.f32 %v1309_v22, %v329_v21  ;;  %v331_v24 = vmul.f32 %v329_v21, %v247_v20 }
 0x2dc   :  { %334 = vrot.lane.b32.xlu1 %v332_v23, %s1404_s1 }
 0x34e   :  { %v335_v26 = vpop.permute.xlu1 %334 }
 0x34f   :  { %v337_v27 = vadd.f32 %v335_v26, %v331_v24  ;;  %v200_v26 = vadd.f32 %v1540_v1, %v1449_v9 }
 0x351   :  { %1310 = vtanh.f32 %v337_v27 }
 0x35b   :  { %v1311_v31 = vpop.eup %1310 }
 0x35c   :  { %v339_v32 = vmul.f32 %v1311_v31, %v330_v30 }
 0x35e   :  { %341 = vrot.lane.b32.xlu0 %v339_v32, %s1404_s1 }
 0x3d0   :  { %v342_v34 = vpop.permute.xlu0 %341 }
 0x3d1   :  { %1095 = vmatmul.mubr.msk.f32.vlgmr.msra.gmra.mrb[4].mxu1 %vm251_vm2, %v342_v34 }
 0x3d2   :  { %1128 = vmatprep.mubr.msk.f32.mxu1 %vm1406_vm3, %v1403_v0 }
 0x4a4   :  { %v411_v36 = vpop.f32.mrb[4].mxu1 }
 0x4a5   :  { %v1265_v37 = vadd.f32 %v411_v36, %v1449_v9  ;;  %v413_v39 = vpop.f32.mrb[5].mxu1 }
 0x4a6   :  { %v1266_v40 = vadd.f32 %v413_v39, %v1451_v10 }
 0x4a7   :  { %1312 = vtanh.f32 %v1265_v37 }
 0x4a8   :  { %1314 = vtanh.f32 %v1266_v40 }
 0x4b1   :  { %v1313_v41 = vpop.eup %1312 }
 0x4b2   :  { %v418_v42 = vmul.f32 0.5, %v1313_v41  ;;  %v1315_v46 = vpop.eup %1314 }
 0x4b3   :  { %v419_v52 = vmul.f32 0.5, %v1315_v46 }
 0x4b4   :  { %v420_v43 = vadd.f32 0.5, %v418_v42 }
 0x4b5   :  { %v421_v53 = vadd.f32 0.5, %v419_v52 }
 0x4b6   :  { %v423_v47 = vmul.f32 %v1315_v46, %v420_v43  ;;  %v422_v48 = vmul.f32 %v420_v43, %v337_v27  ;;  %v202_v27 = vadd.f32 %v1542_v2, %v1451_v10 }
 0x4b8   :  { %425 = vrot.lane.b32.xlu1 %v423_v47, %s1404_s1 }
 0x52a   :  { %v426_v50 = vpop.permute.xlu1 %425 }
 0x52b   :  { %v428_v51 = vadd.f32 %v426_v50, %v422_v48  ;;  %v206_v50 = vadd.f32 %v1544_v3, %v1449_v9 }
 0x52d   :  { %1316 = vtanh.f32 %v428_v51 }
 0x537   :  { %v1317_v54 = vpop.eup %1316 }
 0x538   :  { %v430_v55 = vmul.f32 %v1317_v54, %v421_v53 }
 0x53a   :  { %432 = vrot.lane.b32.xlu0 %v430_v55, %s1404_s1 }
 0x5ac   :  { %v433_v56 = vpop.permute.xlu0 %432 }
 0x5ad   :  { %1096 = vmatmul.mubr.msk.f32.vlgmr.msra.gmra.mrb[0].mxu0 %vm251_vm2, %v433_v56 }
 0x5ae   :  { %1182 = vmatpush1.bf16.msra.mxu0 %v1469_v28  ;;  %591 = vmatprep.mubr.f32.mxu0 %v1403_v0 }
 0x5af   :  { %1184 = vmatprep.subr.bf16.mxu0 %v1477_v33 }
 0x5b2   :  { %1186 = vmatpush1.bf16.msra.mxu0 %v1480_v35 }
 0x5b3   :  { %1188 = vmatprep.subr.bf16.mxu0 %v1484_v38 }
 0x5b6   :  { %1190 = vmatpush1.bf16.msra.mxu0 %v1494_v44 }
 0x5b7   :  { %1192 = vmatprep.subr.bf16.mxu0 %v1497_v45 }
 0x5ba   :  { %1194 = vmatpush1.bf16.msra.mxu0 %v1507_v49 }
 0x5bb   :  { %1196 = vmatprep.subr.bf16.mxu0 %v1464_v25 }
 0x680   :  { %v502_v59 = vpop.f32.mrb[0].mxu0 }
 0x681   :  { %v503_v60 = vadd.f32 %v502_v59, %v194_v57  ;;  %v504_v61 = vpop.f32.mrb[1].mxu0 }
 0x682   :  { %v505_v13 = vadd.f32 %v504_v61, %v196_v58 }
 0x683   :  { %1318 = vtanh.f32 %v503_v60 }
 0x684   :  { %1320 = vtanh.f32 %v505_v13 }
 0x68d   :  { %v1319_v14 = vpop.eup %1318 }
 0x68e   :  { %v509_v15 = vmul.f32 0.5, %v1319_v14  ;;  %v1321_v17 = vpop.eup %1320 }
 0x68f   :  { %v510_v62 = vmul.f32 0.5, %v1321_v17 }
 0x690   :  { %v511_v16 = vadd.f32 0.5, %v509_v15 }
 0x691   :  { %v512_v22 = vadd.f32 0.5, %v510_v62 }
 0x692   :  { %v514_v18 = vmul.f32 %v1321_v17, %v511_v16  ;;  %v513_v19 = vmul.f32 %v511_v16, %v428_v51  ;;  %v208_v51 = vadd.f32 %v1546_v4, %v1451_v10  ;;  %v212_v17 = vadd.f32 %v1548_v7, %v1449_v9 }
 0x694   :  { %516 = vrot.lane.b32.xlu1 %v514_v18, %s1404_s1 }
 0x706   :  { %v517_v20 = vpop.permute.xlu1 %516 }
 0x707   :  { %v519_v21 = vadd.f32 %v517_v20, %v513_v19 }
 0x709   :  { %1322 = vtanh.f32 %v519_v21 }
 0x713   :  { %v1323_v63 = vpop.eup %1322 }
 0x714   :  { %v521_v23 = vmul.f32 %v1323_v63, %v512_v22 }
 0x716   :  { %523 = vrot.lane.b32.xlu0 %v521_v23, %s1404_s1 }
 0x788   :  { %v524_v24 = vpop.permute.xlu0 %523 }
 0x789   :  { %1097 = vmatmul.mubr.msk.f32.vlgmr.msra.gmra.mrb[2].mxu0 %vm251_vm2, %v524_v24 }
 0x78a   :  { %1198 = vmatpush1.bf16.msra.mxu0 %v1469_v28  ;;  %682 = vmatprep.mubr.f32.mxu0 %v1403_v0 }
 0x78b   :  { %1200 = vmatprep.subr.bf16.mxu0 %v1477_v33 }
 0x78e   :  { %1202 = vmatpush1.bf16.msra.mxu0 %v1480_v35 }
 0x78f   :  { %1204 = vmatprep.subr.bf16.mxu0 %v1484_v38 }
 0x792   :  { %1206 = vmatpush1.bf16.msra.mxu0 %v1494_v44 }
 0x793   :  { %1208 = vmatprep.subr.bf16.mxu0 %v1497_v45 }
 0x796   :  { %1210 = vmatpush1.bf16.msra.mxu0 %v1507_v49 }
 0x797   :  { %1212 = vmatprep.subr.bf16.mxu0 %v1464_v25 }
 0x85c   :  { %v593_v29 = vpop.f32.mrb[2].mxu0 }
 0x85d   :  { %v594_v30 = vadd.f32 %v593_v29, %v200_v26  ;;  %v595_v31 = vpop.f32.mrb[3].mxu0  ;;  %v218_v26 = vadd.f32 %v1552_v11, %v1449_v9  ;;  %v1405_v9 = vmov 0.0|0.0  }
 0x85e   :  { %v596_v32 = vadd.f32 %v595_v31, %v202_v27  ;;  %v220_v27 = vadd.f32 %v1554_v12, %v1451_v10  ;;  %1243 = vmatprep.subr.bf16.mxu1 %v1405_v9 }
 0x85f   :  { %1324 = vtanh.f32 %v594_v30 }
 0x860   :  { %1326 = vtanh.f32 %v596_v32 }
 0x869   :  { %v1325_v34 = vpop.eup %1324 }
 0x86a   :  { %v600_v36 = vmul.f32 0.5, %v1325_v34  ;;  %v1327_v39 = vpop.eup %1326 }
 0x86b   :  { %v601_v1 = vmul.f32 0.5, %v1327_v39 }
 0x86c   :  { %v602_v37 = vadd.f32 0.5, %v600_v36 }
 0x86d   :  { %v603_v46 = vadd.f32 0.5, %v601_v1  ;;  %v50_v1 = vld [vmem:[#allocation2 + $0xe0] sm:$0xff] }
 0x86e   :  { %v605_v40 = vmul.f32 %v1327_v39, %v602_v37  ;;  %v604_v41 = vmul.f32 %v602_v37, %v519_v21 }
 0x870   :  { %607 = vrot.lane.b32.xlu1 %v605_v40, %s1404_s1 }
 0x8e2   :  { %v608_v42 = vpop.permute.xlu1 %607 }
 0x8e3   :  { %v610_v43 = vadd.f32 %v608_v42, %v604_v41  ;;  %v46_v41 = vld [vmem:[#allocation2 + $0xa0] sm:$0xff]  ;;  %v47_v42 = vld [vmem:[#allocation2 + $0xb0] sm:$0xff] }
 0x8e4   :  { %v1244_v11 = vpack.c.bf16 %v47_v42, %v46_v41 }
 0x8e5   :  { %1328 = vtanh.f32 %v610_v43 }
 0x8e6   :  { %1245 = vmatpush3.bf16.msra.mxu1 %v1244_v11 }
 0x8e7   :  { %1246 = vmatprep.subr.bf16.mxu1 %v1405_v9 }
 0x8ef   :  { %v1329_v2 = vpop.eup %1328 }
 0x8f0   :  { %v612_v47 = vmul.f32 %v1329_v2, %v603_v46  ;;  %v51_v46 = vld [vmem:[#allocation2 + $0xf0] sm:$0xff] }
 0x8f1   :  { %v1250_v2 = vpack.c.bf16 %v51_v46, %v50_v1 }
 0x8f2   :  { %614 = vrot.lane.b32.xlu0 %v612_v47, %s1404_s1  ;;  %v52_v47 = vld [vmem:[#allocation2 + $0x100] sm:$0xff] }
 0x964   :  { %v615_v48 = vpop.permute.xlu0 %614 }
 0x965   :  { %1098 = vmatmul.mubr.msk.f32.vlgmr.msra.gmra.mrb[4].mxu0 %vm251_vm2, %v615_v48  ;;  %v53_v48 = vld [vmem:[#allocation2 + $0x110] sm:$0xff] }
 0x966   :  { %1214 = vmatpush1.bf16.msra.mxu0 %v1469_v28  ;;  %773 = vmatprep.mubr.f32.mxu0 %v1403_v0 }
 0x967   :  { %1216 = vmatprep.subr.bf16.mxu0 %v1477_v33 }
 0x96a   :  { %1218 = vmatpush1.bf16.msra.mxu0 %v1480_v35 }
 0x96b   :  { %1220 = vmatprep.subr.bf16.mxu0 %v1484_v38 }
 0x96e   :  { %1222 = vmatpush1.bf16.msra.mxu0 %v1494_v44 }
 0x96f   :  { %1224 = vmatprep.subr.bf16.mxu0 %v1497_v45 }
 0x972   :  { %1226 = vmatpush1.bf16.msra.mxu0 %v1507_v49 }
 0x973   :  { %1228 = vmatprep.subr.bf16.mxu0 %v1464_v25 }
 0xa38   :  { %v684_v52 = vpop.f32.mrb[4].mxu0 }
 0xa39   :  { %v685_v53 = vadd.f32 %v684_v52, %v206_v50  ;;  %v686_v54 = vpop.f32.mrb[5].mxu0  ;;  %v1253_v50 = vpack.c.bf16 %v53_v48, %v52_v47 }
 0xa3a   :  { %v687_v55 = vadd.f32 %v686_v54, %v208_v51 }
 0xa3b   :  { %1330 = vtanh.f32 %v685_v53 }
 0xa3c   :  { %1332 = vtanh.f32 %v687_v55 }
 0xa45   :  { %v1331_v56 = vpop.eup %1330 }
 0xa46   :  { %v691_v57 = vmul.f32 0.5, %v1331_v56  ;;  %v1333_v59 = vpop.eup %1332 }
 0xa47   :  { %v692_v3 = vmul.f32 0.5, %v1333_v59 }
 0xa48   :  { %v693_v58 = vadd.f32 0.5, %v691_v57 }
 0xa49   :  { %v694_v14 = vadd.f32 0.5, %v692_v3 }
 0xa4a   :  { %v696_v60 = vmul.f32 %v1333_v59, %v693_v58  ;;  %v695_v25 = vmul.f32 %v693_v58, %v610_v43  ;;  %v48_v43 = vld [vmem:[#allocation2 + $0xc0] sm:$0xff] }
 0xa4b   :  { %v54_v59 = vld [vmem:[#allocation2 + $0x120] ss:$0 sm:$0xff] }
 0xa4c   :  { %698 = vrot.lane.b32.xlu1 %v696_v60, %s1404_s1 }
 0xabe   :  { %v699_v61 = vpop.permute.xlu1 %698 }
 0xabf   :  { %v701_v13 = vadd.f32 %v699_v61, %v695_v25 }
 0xac1   :  { %1334 = vtanh.f32 %v701_v13 }
 0xacb   :  { %v1335_v4 = vpop.eup %1334 }
 0xacc   :  { %v703_v15 = vmul.f32 %v1335_v4, %v694_v14 }
 0xace   :  { %705 = vrot.lane.b32.xlu0 %v703_v15, %s1404_s1 }
 0xb40   :  { %v706_v16 = vpop.permute.xlu0 %705 }
 0xb41   :  { %1099 = vmatmul.mubr.msk.f32.vlgmr.msra.gmra.mrb[6].mxu0 %vm251_vm2, %v706_v16 }
 0xb42   :  { %1230 = vmatpush1.bf16.msra.mxu0 %v1469_v28  ;;  %864 = vmatprep.mubr.f32.mxu0 %v1403_v0  ;;  %v214_v28 = vadd.f32 %v1550_v8, %v1451_v10  ;;  %v49_v10 = vld [vmem:[#allocation2 + $0xd0] sm:$0xff] }
 0xb43   :  { %1232 = vmatprep.subr.bf16.mxu0 %v1477_v33  ;;  %v1247_v12 = vpack.c.bf16 %v49_v10, %v48_v43 }
 0xb45   :  { %1248 = vmatpush3.bf16.msra.mxu1 %v1247_v12 }
 0xb46   :  { %1234 = vmatpush1.bf16.msra.mxu0 %v1480_v35  ;;  %1249 = vmatprep.subr.bf16.mxu1 %v1405_v9 }
 0xb47   :  { %1236 = vmatprep.subr.bf16.mxu0 %v1484_v38 }
 0xb49   :  { %1251 = vmatpush3.bf16.msra.mxu1 %v1250_v2 }
 0xb4a   :  { %1238 = vmatpush1.bf16.msra.mxu0 %v1494_v44  ;;  %1252 = vmatprep.subr.bf16.mxu1 %v1405_v9 }
 0xb4b   :  { %1240 = vmatprep.subr.bf16.mxu0 %v1497_v45 }
 0xb4d   :  { %1254 = vmatpush3.bf16.msra.mxu1 %v1253_v50 }
 0xb4e   :  { %1242 = vmatpush1.bf16.msra.mxu0 %v1507_v49 }
 0xc14   :  { %v775_v18 = vpop.f32.mrb[6].mxu0 }
 0xc15   :  { %v776_v19 = vadd.f32 %v775_v18, %v212_v17  ;;  %v777_v20 = vpop.f32.mrb[7].mxu0 }
 0xc16   :  { %v778_v33 = vadd.f32 %v777_v20, %v214_v28  ;;  %v55_v20 = vld [vmem:[#allocation2 + $0x130] sm:$0xff] }
 0xc17   :  { %1336 = vtanh.f32 %v776_v19  ;;  %v58_v19 = vld [vmem:[#allocation2 + $0x148] sm:$0xff] }
 0xc18   :  { %1338 = vtanh.f32 %v778_v33 }
 0xc21   :  { %v1337_v35 = vpop.eup %1336 }
 0xc22   :  { %v782_v38 = vmul.f32 0.5, %v1337_v35  ;;  %v1339_v44 = vpop.eup %1338  ;;  %v57_v35 = vld [vmem:[#allocation2 + $0x140] sm:$0xff] }
 0xc23   :  { %v783_v7 = vmul.f32 0.5, %v1339_v44 }
 0xc24   :  { %v784_v21 = vadd.f32 0.5, %v782_v38  ;;  %v60_v38 = vld [vmem:[#allocation2 + $0x158] sm:$0xff] }
 0xc25   :  { %v785_v63 = vadd.f32 0.5, %v783_v7 }
 0xc26   :  { %v787_v62 = vmul.f32 %v1339_v44, %v784_v21  ;;  %v786_v45 = vmul.f32 %v784_v21, %v701_v13  ;;  %v62_v21 = vld [vmem:[#allocation2 + $0x168] sm:$0xff]  ;;  %v1257_v44 = vpack.c.bf16 %v57_v35, %v55_v20 }
 0xc28   :  { %789 = vrot.lane.b32.xlu1 %v787_v62, %s1404_s1  ;;  %v1259_v62 = vpack.c.bf16 %v62_v21, %v60_v38 }
 0xc9a   :  { %v790_v49 = vpop.permute.xlu1 %789 }
 0xc9b   :  { %v792_v22 = vadd.f32 %v790_v49, %v786_v45  ;;  %v59_v45 = vld [vmem:[#allocation2 + $0x150] sm:$0xff]  ;;  %v61_v49 = vld [vmem:[#allocation2 + $0x160] sm:$0xff] }
 0xc9d   :  { %1340 = vtanh.f32 %v792_v22 }
 0xca7   :  { %v1341_v8 = vpop.eup %1340 }
 0xca8   :  { %v794_v23 = vmul.f32 %v1341_v8, %v785_v63 }
 0xcaa   :  { %796 = vrot.lane.b32.xlu0 %v794_v23, %s1404_s1 }
 0xd1c   :  { %v797_v24 = vpop.permute.xlu0 %796 }
 0xd1d   :  { %1100 = vmatmul.mubr.msk.f32.vlgmr.msra.gmra.mrb[8].mxu0 %vm251_vm2, %v797_v24 }
 0xdf0   :  { %v866_v29 = vpop.f32.mrb[8].mxu0 }
 0xdf1   :  { %v867_v30 = vadd.f32 %v866_v29, %v218_v26  ;;  %v868_v31 = vpop.f32.mrb[9].mxu0  ;;  %v64_v26 = vld [vmem:[#allocation2 + $0x170] ss:$8 sm:$0x3] }
 0xdf2   :  { %v869_v32 = vadd.f32 %v868_v31, %v220_v27  ;;  %v990_v27 = vrot.slane %v64_v26, %v76_v6 }
 0xdf3   :  { %1342 = vtanh.f32 %v867_v30 }
 0xdf4   :  { %1344 = vtanh.f32 %v869_v32 }
 0xdfd   :  { %v1343_v34 = vpop.eup %1342 }
 0xdfe   :  { %v873_v36 = vmul.f32 0.5, %v1343_v34  ;;  %v1345_v39 = vpop.eup %1344 }
 0xdff   :  { %v874_v54 = vmul.f32 0.5, %v1345_v39 }
 0xe00   :  { %v875_v37 = vadd.f32 0.5, %v873_v36 }
 0xe01   :  { %v876_v55 = vadd.f32 0.5, %v874_v54 }
 0xe02   :  { %v878_v40 = vmul.f32 %v1345_v39, %v875_v37  ;;  %v877_v51 = vmul.f32 %v875_v37, %v792_v22  ;;  %v1261_v22 = vpack.c.bf16 %v61_v49, %v59_v45 }
 0xe04   :  { %880 = vrot.lane.b32.xlu1 %v878_v40, %s1404_s1 }
 0xe76   :  { %v881_v52 = vpop.permute.xlu1 %880 }
 0xe77   :  { %v883_v53 = vadd.f32 %v881_v52, %v877_v51 }
 0xe79   :  { %1346 = vtanh.f32 %v883_v53 }
 0xe83   :  { %v1347_v56 = vpop.eup %1346 }
 0xe84   :  { %v885_v57 = vmul.f32 %v1347_v56, %v876_v55 }
 0xe86   :  { %887 = vrot.lane.b32.xlu0 %v885_v57, %s1404_s1 }
 0xe8a   :  { %965 = vrot.lane.b32.xlu0 %v883_v53, %s1404_s1 }
 0xef8   :  { %v888_v58 = vpop.permute.xlu0 %887 }
 0xef9   :  { %1129 = vmatmul.mubr.msk.f32.vlgmr.msra.gmra.mrb[16].mxu1 %vm251_vm2, %v888_v58 }
 0xefa   :  { %1062 = vmatprep.mubr.f32.mxu1 %v1403_v0  ;;  %v56_v0 = vld [vmem:[#allocation2 + $0x138] sm:$0xff] }
 0xefb   :  { %v1255_v33 = vpack.c.bf16 %v58_v19, %v56_v0 }
 0xefc   :  { %v966_v16 = vpop.permute.xlu0 %965 }
 0xefd   :  { %1256 = vmatprep.subr.bf16.mxu1 %v1255_v33 }
 0xefe   :  { %1258 = vmatpush1.bf16.msra.mxu1 %v1257_v44 }
 0xeff   :  { %1260 = vmatprep.subr.bf16.mxu1 %v1259_v62 }
 0xf02   :  { %1262 = vmatpush1.bf16.msra.mxu1 %v1261_v22 }
 0xfcc   :  { %v957_v60 = vpop.f32.mrb[16].mxu1 }
 0xfcd   :  { %v958_v25 = vadd.f32 %v957_v60, %v54_v59  ;;  %v1130_v61 = vpop.f32.mrb[17].mxu1 }
 0xfcf   :  { %1348 = vtanh.f32 %v958_v25 }
 0xfd9   :  { %v1349_v13 = vpop.eup %1348 }
 0xfda   :  { %970 = vrot.lane.b32.xlu1 %v1349_v13, %s1404_s1  ;;  %v962_v3 = vmul.f32 0.5, %v1349_v13 }
 0xfdc   :  { %v963_v14 = vadd.f32 0.5, %v962_v3 }
 0xfde   :  { %v968_v17 = vmul.f32 %v966_v16, %v963_v14 }
0x104c   :  { %v971_v4 = vpop.permute.xlu1 %970 }
0x104d   :  { %v973_v15 = vmul.f32 %v971_v4, %v963_v14 }
0x104f   :  { %975 = vrot.lane.b32.xlu1 %v973_v15, %s1407_s0 }
0x10c1   :  { %v976_v28 = vpop.permute.xlu1 %975 }
0x10c2   :  { %v978_v18 = vadd.f32 %v976_v28, %v968_v17 }
0x10c4   :  { %1350 = vtanh.f32 %v978_v18 }
0x10ce   :  { %v1351_v7 = vpop.eup %1350 }
0x10cf   :  { %981 = vrot.lane.b32.xlu0 %v1351_v7, %s1404_s1 }
0x1141   :  { %v982_v63 = vpop.permute.xlu0 %981 }
0x1142   :  { %v984_v8 = vmul.f32 %v982_v63, %v963_v14 }
0x1144   :  { %v985_v23 = vmax.f32 %v984_v8, 0.0 }
0x1146   :  { %993 = vrot.lane.b32.xlu1 %v985_v23, %s1407_s0 }
0x11b8   :  { %v994_v24 = vpop.permute.xlu1 %993 }
0x11b9   :  { %1102 = vmatmul.mubr.msk.f32.vlgmr.msra.gmra.mrb[18].mxu1 %vm995_vm4, %v994_v24 }
0x128c   :  { %v1064_v29 = vpop.f32.mrb[18].mxu1 }
0x128d   :  { %v1065_v30 = vadd.f32 %v1064_v29, %v990_v27  ;;  %v1066_v31 = vpop.f32.mrb[19].mxu1 }
0x128f   :  { %1069 = vst.msk [vmem:[#allocation5] sm:$0xf] %vm1068_vm5, %v1065_v30 }
0x1290   :  { %1385 = shalt.err (!%p1382_p12)
}
0x1291   :  { %s1386_s16 = scalar_lea.hbm %s1666_s2, 64 }
0x1292   :  { %p1387_p13 = scmp.ne.s32.totalorder %s1666_s2, %s1386_s16  ;;  %p1390_p0 = scmp.lt.u32.totalorder %s1386_s16, %s1666_s2 }
0x1294   :  { %p1392_p1 = pnand %p1390_p0, %p1387_p13 }
0x1296   :  { %1395 = shalt.err (!%p1392_p1)
}
0x1297   :  { %1079 = dma.vmem_to_hbm [thread:$0]  %s1077_s12, 64, %s1666_s2, [#allocation4]  }
0x1298   :  { %1398 = dma.done.wait [#allocation4], 64  }
0x1299   :  { %1399 = vsyncadd [#allocation4], 4294967232 }
0x129a   :  { %1083 = vsyncpa [#allocation3], 1 }
0x129b   :  { %1084 = vsyncpa [#allocation4], 1 }

</bundles_post_ra>
